<compile_context>
chip_gen: v7x
topology: tpu7x:2x2x1
jax: 0.10.0
libtpu: 0.0.40
codegen_flags: <defaults>
</compile_context>

<pallas_src>
import math

import jax
import jax.numpy as jnp
from jax import lax
from jax.experimental import pallas as pl
from jax.experimental.pallas import tpu as pltpu

LN_EPS = 1e-5  # PyTorch nn.LayerNorm default


def _layernorm(y, gamma, beta):
    mu = jnp.mean(y, axis=-1, keepdims=True)
    var = jnp.mean(jnp.square(y - mu), axis=-1, keepdims=True)
    return (y - mu) * lax.rsqrt(var + LN_EPS) * gamma + beta


def channel_attention_kernel(
    x_ref,        # (S, C)  input slice, channel-last
    pool_ref,     # (E, S)  avg-pool matrix (1/inter inside window, else 0)
    wq_ref, bq_ref, gq_ref, betq_ref,
    wk_ref, bk_ref, gk_ref, betk_ref,
    wp_ref, bp_ref, gp_ref, betp_ref,
    o_ref,        # (S, C)  output slice, channel-last
):
    x = x_ref[...]                                    # (S, C) f32
    C = x.shape[1]
    E = pool_ref.shape[0]

    # query / key branches: Linear on the channel dim + LayerNorm (MXU matmuls).
    q = _layernorm(
        jnp.dot(x, wq_ref[...], preferred_element_type=jnp.float32) + bq_ref[...],
        gq_ref[...], betq_ref[...])
    k = _layernorm(
        jnp.dot(x, wk_ref[...], preferred_element_type=jnp.float32) + bk_ref[...],
        gk_ref[...], betk_ref[...])

    # AvgPool2d(kernel=(1, inter), stride=(1, inter)) along s as a small matmul:
    #   q_pool[e, c] = mean_{s in window e} q[s, c]
    p = pool_ref[...]                                                 # (E, S)
    q_pool = jnp.dot(p, q, preferred_element_type=jnp.float32)        # (E, C)
    k_pool = jnp.dot(p, k, preferred_element_type=jnp.float32)        # (E, C)

    # channel attention: atten[c, m] = sum_e q_pool[e, c] * k_pool[e, m]
    atten = lax.dot_general(q_pool, k_pool, (((0,), (0,)), ((), ())),
                            preferred_element_type=jnp.float32)       # (C, C)
    atten = atten * (1.0 / math.sqrt(E))    # / extract_sequence ** 0.5

    # softmax over the last (m) dim
    atten = atten - jnp.max(atten, axis=-1, keepdims=True)
    e_att = jnp.exp(atten)
    score = e_att / jnp.sum(e_att, axis=-1, keepdims=True)            # (C, C)

    # Faithful to einsum 'b o c s, b o c m -> b o c s': m is contracted, so
    # out[s, c] = x[s, c] * sum_m score[c, m].  Compute the row-sums already
    # laid out along lanes (1, C) via a tiny dot_general (no relayout needed).
    ones_row = jnp.ones((1, C), jnp.float32)
    row_sum = lax.dot_general(ones_row, score, (((1,), (1,)), ((), ())),
                              preferred_element_type=jnp.float32)     # (1, C)
    out = x * row_sum                                                 # (S, C)

    # projection: Linear on the channel dim + LayerNorm
    proj = _layernorm(
        jnp.dot(out, wp_ref[...], preferred_element_type=jnp.float32) + bp_ref[...],
        gp_ref[...], betp_ref[...])
    o_ref[...] = proj.astype(o_ref.dtype)


def channel_attention(x, params, inter):
    """x: (B, O, C, S) channel-first (like the PyTorch module).  Returns (B, O, C, S)."""
    B, O, C, S = x.shape
    assert S % inter == 0, "sequence_num must be divisible by inter"
    E = S // inter

    # channel-last, lane-dense layout for the kernel; (b, o) flattened onto the grid.
    xt = jnp.swapaxes(x, -1, -2).reshape(B * O, S, C)

    # average-pooling matrix, built once and kept resident in VMEM across the grid.
    rows = jnp.arange(E)[:, None]
    cols = jnp.arange(S)[None, :]
    pool = jnp.where(cols // inter == rows, 1.0 / inter, 0.0).astype(jnp.float32)

    slice_spec = pl.BlockSpec((pl.Squeezed(), S, C), lambda i: (i, 0, 0))
    mat_spec = pl.BlockSpec((C, C), lambda i: (0, 0))
    vec_spec = pl.BlockSpec((1, C), lambda i: (0, 0))
    pool_spec = pl.BlockSpec((E, S), lambda i: (0, 0))

    flops = B * O * (3 * 2 * S * C * C + 2 * 2 * E * S * C + 2 * C * C * E + 2 * C * C)
    transcendentals = B * O * (C * C + 3 * S)          # exp + rsqrt
    bytes_accessed = 4 * (2 * x.size + pool.size + 3 * C * C + 8 * C)

    out = pl.pallas_call(
        channel_attention_kernel,
        out_shape=jax.ShapeDtypeStruct((B * O, S, C), x.dtype),
        grid=(B * O,),
        in_specs=[
            slice_spec, pool_spec,
            mat_spec, vec_spec, vec_spec, vec_spec,    # query:      W, b, gamma, beta
            mat_spec, vec_spec, vec_spec, vec_spec,    # key:        W, b, gamma, beta
            mat_spec, vec_spec, vec_spec, vec_spec,    # projection: W, b, gamma, beta
        ],
        out_specs=slice_spec,
        compiler_params=pltpu.CompilerParams(dimension_semantics=("parallel",)),
        cost_estimate=pl.CostEstimate(flops=flops, transcendentals=transcendentals,
                                      bytes_accessed=bytes_accessed),
    )(xt, pool,
      params["wq"], params["bq"], params["gq"], params["betq"],
      params["wk"], params["bk"], params["gk"], params["betk"],
      params["wp"], params["bp"], params["gp"], params["betp"])

    return jnp.swapaxes(out.reshape(B, O, S, C), -1, -2)


def reference(x, params, inter):
    """Pure-JAX mirror of channel_attention.forward (dropout = identity)."""
    B, O, C, S = x.shape
    E = S // inter

    def ln(y, g, b):
        mu = y.mean(-1, keepdims=True)
        var = ((y - mu) ** 2).mean(-1, keepdims=True)
        return (y - mu) / jnp.sqrt(var + LN_EPS) * g + b

    temp = jnp.swapaxes(x, -1, -2)                                    # (B,O,S,C)
    q = ln(temp @ params["wq"] + params["bq"], params["gq"], params["betq"])
    k = ln(temp @ params["wk"] + params["bk"], params["gk"], params["betk"])
    qT = jnp.swapaxes(q, -1, -2)                                      # (B,O,C,S)
    kT = jnp.swapaxes(k, -1, -2)
    q_pool = qT.reshape(B, O, C, E, inter).mean(-1)                   # (B,O,C,E)
    k_pool = kT.reshape(B, O, C, E, inter).mean(-1)
    atten = jnp.einsum("bocs,boms->bocm", q_pool, k_pool) / (E ** 0.5)
    score = jax.nn.softmax(atten, axis=-1)
    out = jnp.einsum("bocs,bocm->bocs", x, score)                     # m contracted
    out_t = jnp.swapaxes(out, -1, -2)
    proj = ln(out_t @ params["wp"] + params["bp"], params["gp"], params["betp"])
    return jnp.swapaxes(proj, -1, -2)


if __name__ == "__main__":
    # TODO(synk): nn.Dropout(0.2)/Dropout(0) are identity in eval mode; training-mode
    # stochastic masking (pltpu.prng_*) is not implemented here.
    key = jax.random.PRNGKey(0)
    ks = jax.random.split(key, 16)

    n_principle_comp = 4
    n_classes = 4
    C = n_classes * n_principle_comp       # 16  (channel dim)
    B, O = 2, 2                            # batch, "o" dim
    S = 64                                 # sequence_num
    inter = 8                              # pooling window -> extract_sequence = 8

    x = jax.random.normal(ks[0], (B, O, C, S), dtype=jnp.float32)

    def xavier(k):
        return jax.random.normal(k, (C, C), dtype=jnp.float32) * math.sqrt(2.0 / (C + C))

    def small(k):
        return jax.random.normal(k, (1, C), dtype=jnp.float32) * 0.02

    params = {
        "wq": xavier(ks[1]), "bq": small(ks[2]), "gq": 1.0 + small(ks[3]), "betq": small(ks[4]),
        "wk": xavier(ks[5]), "bk": small(ks[6]), "gk": 1.0 + small(ks[7]), "betk": small(ks[8]),
        "wp": xavier(ks[9]), "bp": small(ks[10]), "gp": 1.0 + small(ks[11]), "betp": small(ks[12]),
    }

    out = jax.block_until_ready(channel_attention(x, params, inter))
    ref = jax.block_until_ready(reference(x, params, inter))

    assert out.shape == (B, O, C, S)
    assert jnp.allclose(out, ref, atol=1e-4, rtol=1e-4), "mismatch vs reference"

    print("KERNEL_OK")
</pallas_src>

<mosaic_0001>
module attributes {stable_mosaic.version = 11 : i64} {
  func.func @channel_attention_kernel(%arg0: i32, %arg1: memref<1x64x16xf32, #tpu.memory_space<vmem>>, %arg2: memref<8x64xf32, #tpu.memory_space<vmem>>, %arg3: memref<16x16xf32, #tpu.memory_space<vmem>>, %arg4: memref<1x16xf32, #tpu.memory_space<vmem>>, %arg5: memref<1x16xf32, #tpu.memory_space<vmem>>, %arg6: memref<1x16xf32, #tpu.memory_space<vmem>>, %arg7: memref<16x16xf32, #tpu.memory_space<vmem>>, %arg8: memref<1x16xf32, #tpu.memory_space<vmem>>, %arg9: memref<1x16xf32, #tpu.memory_space<vmem>>, %arg10: memref<1x16xf32, #tpu.memory_space<vmem>>, %arg11: memref<16x16xf32, #tpu.memory_space<vmem>>, %arg12: memref<1x16xf32, #tpu.memory_space<vmem>>, %arg13: memref<1x16xf32, #tpu.memory_space<vmem>>, %arg14: memref<1x16xf32, #tpu.memory_space<vmem>>, %arg15: memref<1x64x16xf32, #tpu.memory_space<vmem>>) attributes {dimension_semantics = [#tpu.dimension_semantics<parallel>], iteration_bounds = array<i64: 4>, scalar_prefetch = 0 : i64, scratch_operands = 0 : i64, tpu.core_type = #tpu.core_type<tc>, window_params = [{transform_indices = @transform_0, window_bounds = array<i64: 1, 64, 16>}, {pipeline_mode = #tpu.pipeline_mode<synchronous>, transform_indices = @transform_1, window_bounds = array<i64: 8, 64>}, {pipeline_mode = #tpu.pipeline_mode<synchronous>, transform_indices = @transform_2, window_bounds = array<i64: 16, 16>}, {pipeline_mode = #tpu.pipeline_mode<synchronous>, transform_indices = @transform_3, window_bounds = array<i64: 1, 16>}, {pipeline_mode = #tpu.pipeline_mode<synchronous>, transform_indices = @transform_4, window_bounds = array<i64: 1, 16>}, {pipeline_mode = #tpu.pipeline_mode<synchronous>, transform_indices = @transform_5, window_bounds = array<i64: 1, 16>}, {pipeline_mode = #tpu.pipeline_mode<synchronous>, transform_indices = @transform_6, window_bounds = array<i64: 16, 16>}, {pipeline_mode = #tpu.pipeline_mode<synchronous>, transform_indices = @transform_7, window_bounds = array<i64: 1, 16>}, {pipeline_mode = #tpu.pipeline_mode<synchronous>, transform_indices = @transform_8, window_bounds = array<i64: 1, 16>}, {pipeline_mode = #tpu.pipeline_mode<synchronous>, transform_indices = @transform_9, window_bounds = array<i64: 1, 16>}, {pipeline_mode = #tpu.pipeline_mode<synchronous>, transform_indices = @transform_10, window_bounds = array<i64: 16, 16>}, {pipeline_mode = #tpu.pipeline_mode<synchronous>, transform_indices = @transform_11, window_bounds = array<i64: 1, 16>}, {pipeline_mode = #tpu.pipeline_mode<synchronous>, transform_indices = @transform_12, window_bounds = array<i64: 1, 16>}, {pipeline_mode = #tpu.pipeline_mode<synchronous>, transform_indices = @transform_13, window_bounds = array<i64: 1, 16>}, {transform_indices = @transform_14, window_bounds = array<i64: 1, 64, 16>}]} {
    %c0 = arith.constant 0 : index
    %c0_0 = arith.constant 0 : index
    %c0_1 = arith.constant 0 : index
    %0 = vector.load %arg1[%c0, %c0_0, %c0_1] : memref<1x64x16xf32, #tpu.memory_space<vmem>>, vector<1x64x16xf32>
    %1 = vector.shape_cast %0 : vector<1x64x16xf32> to vector<64x16xf32>
    %c0_2 = arith.constant 0 : index
    %c0_3 = arith.constant 0 : index
    %2 = vector.load %arg3[%c0_2, %c0_3] : memref<16x16xf32, #tpu.memory_space<vmem>>, vector<16x16xf32>
    %cst = arith.constant dense<0.000000e+00> : vector<64x16xf32>
    %3 = tpu.matmul %1, %2, %cst {dimension_numbers = #tpu.dot_dimension_numbers<[1], [0], [0], [1], [0, 0, 1, 1], [], []>} : vector<64x16xf32>, vector<16x16xf32>, vector<64x16xf32> -> vector<64x16xf32>
    %c0_4 = arith.constant 0 : index
    %c0_5 = arith.constant 0 : index
    %4 = vector.load %arg4[%c0_4, %c0_5] : memref<1x16xf32, #tpu.memory_space<vmem>>, vector<1x16xf32>
    %5 = vector.broadcast %4 : vector<1x16xf32> to vector<64x16xf32>
    %6 = arith.addf %3, %5 : vector<64x16xf32>
    %c0_6 = arith.constant 0 : index
    %c0_7 = arith.constant 0 : index
    %7 = vector.load %arg5[%c0_6, %c0_7] : memref<1x16xf32, #tpu.memory_space<vmem>>, vector<1x16xf32>
    %c0_8 = arith.constant 0 : index
    %c0_9 = arith.constant 0 : index
    %8 = vector.load %arg6[%c0_8, %c0_9] : memref<1x16xf32, #tpu.memory_space<vmem>>, vector<1x16xf32>
    %cst_10 = arith.constant dense<0.000000e+00> : vector<64xf32>
    %9 = vector.multi_reduction <add>, %6, %cst_10 [1] : vector<64x16xf32> to vector<64xf32>
    %10 = vector.shape_cast %9 : vector<64xf32> to vector<64x1xf32>
    %cst_11 = arith.constant 1.600000e+01 : f32
    %11 = vector.broadcast %cst_11 : f32 to vector<64x1xf32>
    %12 = arith.divf %10, %11 : vector<64x1xf32>
    %13 = vector.broadcast %12 : vector<64x1xf32> to vector<64x16xf32>
    %14 = arith.subf %6, %13 : vector<64x16xf32>
    %15 = arith.mulf %14, %14 : vector<64x16xf32>
    %cst_12 = arith.constant dense<0.000000e+00> : vector<64xf32>
    %16 = vector.multi_reduction <add>, %15, %cst_12 [1] : vector<64x16xf32> to vector<64xf32>
    %17 = vector.shape_cast %16 : vector<64xf32> to vector<64x1xf32>
    %cst_13 = arith.constant 1.600000e+01 : f32
    %18 = vector.broadcast %cst_13 : f32 to vector<64x1xf32>
    %19 = arith.divf %17, %18 : vector<64x1xf32>
    %20 = vector.broadcast %12 : vector<64x1xf32> to vector<64x16xf32>
    %21 = arith.subf %6, %20 : vector<64x16xf32>
    %cst_14 = arith.constant 9.99999974E-6 : f32
    %22 = vector.broadcast %cst_14 : f32 to vector<64x1xf32>
    %23 = arith.addf %19, %22 : vector<64x1xf32>
    %24 = math.rsqrt %23 : vector<64x1xf32>
    %25 = vector.broadcast %24 : vector<64x1xf32> to vector<64x16xf32>
    %26 = arith.mulf %21, %25 : vector<64x16xf32>
    %27 = vector.broadcast %7 : vector<1x16xf32> to vector<64x16xf32>
    %28 = arith.mulf %26, %27 : vector<64x16xf32>
    %29 = vector.broadcast %8 : vector<1x16xf32> to vector<64x16xf32>
    %30 = arith.addf %28, %29 : vector<64x16xf32>
    %c0_15 = arith.constant 0 : index
    %c0_16 = arith.constant 0 : index
    %31 = vector.load %arg7[%c0_15, %c0_16] : memref<16x16xf32, #tpu.memory_space<vmem>>, vector<16x16xf32>
    %cst_17 = arith.constant dense<0.000000e+00> : vector<64x16xf32>
    %32 = tpu.matmul %1, %31, %cst_17 {dimension_numbers = #tpu.dot_dimension_numbers<[1], [0], [0], [1], [0, 0, 1, 1], [], []>} : vector<64x16xf32>, vector<16x16xf32>, vector<64x16xf32> -> vector<64x16xf32>
    %c0_18 = arith.constant 0 : index
    %c0_19 = arith.constant 0 : index
    %33 = vector.load %arg8[%c0_18, %c0_19] : memref<1x16xf32, #tpu.memory_space<vmem>>, vector<1x16xf32>
    %34 = vector.broadcast %33 : vector<1x16xf32> to vector<64x16xf32>
    %35 = arith.addf %32, %34 : vector<64x16xf32>
    %c0_20 = arith.constant 0 : index
    %c0_21 = arith.constant 0 : index
    %36 = vector.load %arg9[%c0_20, %c0_21] : memref<1x16xf32, #tpu.memory_space<vmem>>, vector<1x16xf32>
    %c0_22 = arith.constant 0 : index
    %c0_23 = arith.constant 0 : index
    %37 = vector.load %arg10[%c0_22, %c0_23] : memref<1x16xf32, #tpu.memory_space<vmem>>, vector<1x16xf32>
    %cst_24 = arith.constant dense<0.000000e+00> : vector<64xf32>
    %38 = vector.multi_reduction <add>, %35, %cst_24 [1] : vector<64x16xf32> to vector<64xf32>
    %39 = vector.shape_cast %38 : vector<64xf32> to vector<64x1xf32>
    %cst_25 = arith.constant 1.600000e+01 : f32
    %40 = vector.broadcast %cst_25 : f32 to vector<64x1xf32>
    %41 = arith.divf %39, %40 : vector<64x1xf32>
    %42 = vector.broadcast %41 : vector<64x1xf32> to vector<64x16xf32>
    %43 = arith.subf %35, %42 : vector<64x16xf32>
    %44 = arith.mulf %43, %43 : vector<64x16xf32>
    %cst_26 = arith.constant dense<0.000000e+00> : vector<64xf32>
    %45 = vector.multi_reduction <add>, %44, %cst_26 [1] : vector<64x16xf32> to vector<64xf32>
    %46 = vector.shape_cast %45 : vector<64xf32> to vector<64x1xf32>
    %cst_27 = arith.constant 1.600000e+01 : f32
    %47 = vector.broadcast %cst_27 : f32 to vector<64x1xf32>
    %48 = arith.divf %46, %47 : vector<64x1xf32>
    %49 = vector.broadcast %41 : vector<64x1xf32> to vector<64x16xf32>
    %50 = arith.subf %35, %49 : vector<64x16xf32>
    %cst_28 = arith.constant 9.99999974E-6 : f32
    %51 = vector.broadcast %cst_28 : f32 to vector<64x1xf32>
    %52 = arith.addf %48, %51 : vector<64x1xf32>
    %53 = math.rsqrt %52 : vector<64x1xf32>
    %54 = vector.broadcast %53 : vector<64x1xf32> to vector<64x16xf32>
    %55 = arith.mulf %50, %54 : vector<64x16xf32>
    %56 = vector.broadcast %36 : vector<1x16xf32> to vector<64x16xf32>
    %57 = arith.mulf %55, %56 : vector<64x16xf32>
    %58 = vector.broadcast %37 : vector<1x16xf32> to vector<64x16xf32>
    %59 = arith.addf %57, %58 : vector<64x16xf32>
    %c0_29 = arith.constant 0 : index
    %c0_30 = arith.constant 0 : index
    %60 = vector.load %arg2[%c0_29, %c0_30] : memref<8x64xf32, #tpu.memory_space<vmem>>, vector<8x64xf32>
    %cst_31 = arith.constant dense<0.000000e+00> : vector<8x16xf32>
    %61 = tpu.matmul %60, %30, %cst_31 {dimension_numbers = #tpu.dot_dimension_numbers<[1], [0], [0], [1], [0, 0, 1, 1], [], []>} : vector<8x64xf32>, vector<64x16xf32>, vector<8x16xf32> -> vector<8x16xf32>
    %cst_32 = arith.constant dense<0.000000e+00> : vector<8x16xf32>
    %62 = tpu.matmul %60, %59, %cst_32 {dimension_numbers = #tpu.dot_dimension_numbers<[1], [0], [0], [1], [0, 0, 1, 1], [], []>} : vector<8x64xf32>, vector<64x16xf32>, vector<8x16xf32> -> vector<8x16xf32>
    %cst_33 = arith.constant dense<0.000000e+00> : vector<16x16xf32>
    %63 = tpu.matmul %61, %62, %cst_33 {dimension_numbers = #tpu.dot_dimension_numbers<[0], [0], [1], [1], [0, 1, 1, 1], [], []>} : vector<8x16xf32>, vector<8x16xf32>, vector<16x16xf32> -> vector<16x16xf32>
    %cst_34 = arith.constant 0.353553385 : f32
    %64 = vector.broadcast %cst_34 : f32 to vector<16x16xf32>
    %65 = arith.mulf %63, %64 : vector<16x16xf32>
    %cst_35 = arith.constant dense<0xFF800000> : vector<16xf32>
    %66 = vector.multi_reduction <maximumf>, %65, %cst_35 [1] : vector<16x16xf32> to vector<16xf32>
    %67 = vector.shape_cast %66 : vector<16xf32> to vector<16x1xf32>
    %68 = vector.broadcast %67 : vector<16x1xf32> to vector<16x16xf32>
    %69 = arith.subf %65, %68 : vector<16x16xf32>
    %70 = math.exp %69 : vector<16x16xf32>
    %cst_36 = arith.constant dense<0.000000e+00> : vector<16xf32>
    %71 = vector.multi_reduction <add>, %70, %cst_36 [1] : vector<16x16xf32> to vector<16xf32>
    %72 = vector.shape_cast %71 : vector<16xf32> to vector<16x1xf32>
    %73 = vector.broadcast %72 : vector<16x1xf32> to vector<16x16xf32>
    %74 = arith.divf %70, %73 : vector<16x16xf32>
    %cst_37 = arith.constant 1.000000e+00 : f32
    %75 = vector.broadcast %cst_37 : f32 to vector<1x16xf32>
    %cst_38 = arith.constant dense<0.000000e+00> : vector<1x16xf32>
    %76 = tpu.matmul %75, %74, %cst_38 {dimension_numbers = #tpu.dot_dimension_numbers<[1], [1], [0], [0], [0, 0, 1, 0], [], []>} : vector<1x16xf32>, vector<16x16xf32>, vector<1x16xf32> -> vector<1x16xf32>
    %77 = vector.broadcast %76 : vector<1x16xf32> to vector<64x16xf32>
    %78 = arith.mulf %1, %77 : vector<64x16xf32>
    %c0_39 = arith.constant 0 : index
    %c0_40 = arith.constant 0 : index
    %79 = vector.load %arg11[%c0_39, %c0_40] : memref<16x16xf32, #tpu.memory_space<vmem>>, vector<16x16xf32>
    %cst_41 = arith.constant dense<0.000000e+00> : vector<64x16xf32>
    %80 = tpu.matmul %78, %79, %cst_41 {dimension_numbers = #tpu.dot_dimension_numbers<[1], [0], [0], [1], [0, 0, 1, 1], [], []>} : vector<64x16xf32>, vector<16x16xf32>, vector<64x16xf32> -> vector<64x16xf32>
    %c0_42 = arith.constant 0 : index
    %c0_43 = arith.constant 0 : index
    %81 = vector.load %arg12[%c0_42, %c0_43] : memref<1x16xf32, #tpu.memory_space<vmem>>, vector<1x16xf32>
    %82 = vector.broadcast %81 : vector<1x16xf32> to vector<64x16xf32>
    %83 = arith.addf %80, %82 : vector<64x16xf32>
    %c0_44 = arith.constant 0 : index
    %c0_45 = arith.constant 0 : index
    %84 = vector.load %arg13[%c0_44, %c0_45] : memref<1x16xf32, #tpu.memory_space<vmem>>, vector<1x16xf32>
    %c0_46 = arith.constant 0 : index
    %c0_47 = arith.constant 0 : index
    %85 = vector.load %arg14[%c0_46, %c0_47] : memref<1x16xf32, #tpu.memory_space<vmem>>, vector<1x16xf32>
    %cst_48 = arith.constant dense<0.000000e+00> : vector<64xf32>
    %86 = vector.multi_reduction <add>, %83, %cst_48 [1] : vector<64x16xf32> to vector<64xf32>
    %87 = vector.shape_cast %86 : vector<64xf32> to vector<64x1xf32>
    %cst_49 = arith.constant 1.600000e+01 : f32
    %88 = vector.broadcast %cst_49 : f32 to vector<64x1xf32>
    %89 = arith.divf %87, %88 : vector<64x1xf32>
    %90 = vector.broadcast %89 : vector<64x1xf32> to vector<64x16xf32>
    %91 = arith.subf %83, %90 : vector<64x16xf32>
    %92 = arith.mulf %91, %91 : vector<64x16xf32>
    %cst_50 = arith.constant dense<0.000000e+00> : vector<64xf32>
    %93 = vector.multi_reduction <add>, %92, %cst_50 [1] : vector<64x16xf32> to vector<64xf32>
    %94 = vector.shape_cast %93 : vector<64xf32> to vector<64x1xf32>
    %cst_51 = arith.constant 1.600000e+01 : f32
    %95 = vector.broadcast %cst_51 : f32 to vector<64x1xf32>
    %96 = arith.divf %94, %95 : vector<64x1xf32>
    %97 = vector.broadcast %89 : vector<64x1xf32> to vector<64x16xf32>
    %98 = arith.subf %83, %97 : vector<64x16xf32>
    %cst_52 = arith.constant 9.99999974E-6 : f32
    %99 = vector.broadcast %cst_52 : f32 to vector<64x1xf32>
    %100 = arith.addf %96, %99 : vector<64x1xf32>
    %101 = math.rsqrt %100 : vector<64x1xf32>
    %102 = vector.broadcast %101 : vector<64x1xf32> to vector<64x16xf32>
    %103 = arith.mulf %98, %102 : vector<64x16xf32>
    %104 = vector.broadcast %84 : vector<1x16xf32> to vector<64x16xf32>
    %105 = arith.mulf %103, %104 : vector<64x16xf32>
    %106 = vector.broadcast %85 : vector<1x16xf32> to vector<64x16xf32>
    %107 = arith.addf %105, %106 : vector<64x16xf32>
    %c0_53 = arith.constant 0 : index
    %c0_54 = arith.constant 0 : index
    %c0_55 = arith.constant 0 : index
    %108 = vector.load %arg15[%c0_53, %c0_54, %c0_55] : memref<1x64x16xf32, #tpu.memory_space<vmem>>, vector<1x64x16xf32>
    %109 = vector.shape_cast %108 : vector<1x64x16xf32> to vector<64x16xf32>
    %110 = vector.shape_cast %107 : vector<64x16xf32> to vector<1x64x16xf32>
    tpu.vector_store %arg15[%c0_53, %c0_54, %c0_55], %110 {strides = array<i32>} : memref<1x64x16xf32, #tpu.memory_space<vmem>>, vector<1x64x16xf32>,
    return
  }
  func.func @transform_0(%arg0: i32) -> (i32, i32, i32) {
    %c0_i32 = arith.constant 0 : i32
    %c0_i32_0 = arith.constant 0 : i32
    %c0_i32_1 = arith.constant 0 : i32
    return %arg0, %c0_i32, %c0_i32_0 : i32, i32, i32
  }
  func.func @transform_1(%arg0: i32) -> (i32, i32) {
    %c0_i32 = arith.constant 0 : i32
    %c0_i32_0 = arith.constant 0 : i32
    %c0_i32_1 = arith.constant 0 : i32
    return %c0_i32, %c0_i32_0 : i32, i32
  }
  func.func @transform_2(%arg0: i32) -> (i32, i32) {
    %c0_i32 = arith.constant 0 : i32
    %c0_i32_0 = arith.constant 0 : i32
    %c0_i32_1 = arith.constant 0 : i32
    return %c0_i32, %c0_i32_0 : i32, i32
  }
  func.func @transform_3(%arg0: i32) -> (i32, i32) {
    %c0_i32 = arith.constant 0 : i32
    %c0_i32_0 = arith.constant 0 : i32
    %c0_i32_1 = arith.constant 0 : i32
    return %c0_i32, %c0_i32_0 : i32, i32
  }
  func.func @transform_4(%arg0: i32) -> (i32, i32) {
    %c0_i32 = arith.constant 0 : i32
    %c0_i32_0 = arith.constant 0 : i32
    %c0_i32_1 = arith.constant 0 : i32
    return %c0_i32, %c0_i32_0 : i32, i32
  }
  func.func @transform_5(%arg0: i32) -> (i32, i32) {
    %c0_i32 = arith.constant 0 : i32
    %c0_i32_0 = arith.constant 0 : i32
    %c0_i32_1 = arith.constant 0 : i32
    return %c0_i32, %c0_i32_0 : i32, i32
  }
  func.func @transform_6(%arg0: i32) -> (i32, i32) {
    %c0_i32 = arith.constant 0 : i32
    %c0_i32_0 = arith.constant 0 : i32
    %c0_i32_1 = arith.constant 0 : i32
    return %c0_i32, %c0_i32_0 : i32, i32
  }
  func.func @transform_7(%arg0: i32) -> (i32, i32) {
    %c0_i32 = arith.constant 0 : i32
    %c0_i32_0 = arith.constant 0 : i32
    %c0_i32_1 = arith.constant 0 : i32
    return %c0_i32, %c0_i32_0 : i32, i32
  }
  func.func @transform_8(%arg0: i32) -> (i32, i32) {
    %c0_i32 = arith.constant 0 : i32
    %c0_i32_0 = arith.constant 0 : i32
    %c0_i32_1 = arith.constant 0 : i32
    return %c0_i32, %c0_i32_0 : i32, i32
  }
  func.func @transform_9(%arg0: i32) -> (i32, i32) {
    %c0_i32 = arith.constant 0 : i32
    %c0_i32_0 = arith.constant 0 : i32
    %c0_i32_1 = arith.constant 0 : i32
    return %c0_i32, %c0_i32_0 : i32, i32
  }
  func.func @transform_10(%arg0: i32) -> (i32, i32) {
    %c0_i32 = arith.constant 0 : i32
    %c0_i32_0 = arith.constant 0 : i32
    %c0_i32_1 = arith.constant 0 : i32
    return %c0_i32, %c0_i32_0 : i32, i32
  }
  func.func @transform_11(%arg0: i32) -> (i32, i32) {
    %c0_i32 = arith.constant 0 : i32
    %c0_i32_0 = arith.constant 0 : i32
    %c0_i32_1 = arith.constant 0 : i32
    return %c0_i32, %c0_i32_0 : i32, i32
  }
  func.func @transform_12(%arg0: i32) -> (i32, i32) {
    %c0_i32 = arith.constant 0 : i32
    %c0_i32_0 = arith.constant 0 : i32
    %c0_i32_1 = arith.constant 0 : i32
    return %c0_i32, %c0_i32_0 : i32, i32
  }
  func.func @transform_13(%arg0: i32) -> (i32, i32) {
    %c0_i32 = arith.constant 0 : i32
    %c0_i32_0 = arith.constant 0 : i32
    %c0_i32_1 = arith.constant 0 : i32
    return %c0_i32, %c0_i32_0 : i32, i32
  }
  func.func @transform_14(%arg0: i32) -> (i32, i32, i32) {
    %c0_i32 = arith.constant 0 : i32
    %c0_i32_0 = arith.constant 0 : i32
    %c0_i32_1 = arith.constant 0 : i32
    return %arg0, %c0_i32, %c0_i32_0 : i32, i32, i32
  }
}

</mosaic_0001>

<bundles_post_ra>
// kernel: tpu_custom_call.1
= control target key start
LH: loop header
LB: loop body
LE: loop exit
PB: predicated region body
PF: predicated region fallthrough
CT: control target
= control target key end

     0   :  { %s2107_s29 = smov 0   ;;  %s2529_s0 = inlined_call_operand.vmem [shape: f32[4,64,16], index: 0, kind: input, shape index: {}]   ;;  %s2530_s1 = inlined_call_operand.vmem [shape: f32[8,64], index: 1, kind: input, shape index: {}]   ;;  %s2531_s2 = inlined_call_operand.vmem [shape: f32[16,16], index: 2, kind: input, shape index: {}]   ;;  %s2532_s3 = inlined_call_operand.vmem [shape: f32[1,16], index: 3, kind: input, shape index: {}]   ;;  %s2533_s4 = inlined_call_operand.vmem [shape: f32[1,16], index: 4, kind: input, shape index: {}]   ;;  %s2534_s5 = inlined_call_operand.vmem [shape: f32[1,16], index: 5, kind: input, shape index: {}]   ;;  %s2535_s6 = inlined_call_operand.vmem [shape: f32[16,16], index: 6, kind: input, shape index: {}]   ;;  %s2536_s7 = inlined_call_operand.vmem [shape: f32[1,16], index: 7, kind: input, shape index: {}]   ;;  %s2537_s8 = inlined_call_operand.vmem [shape: f32[1,16], index: 8, kind: input, shape index: {}]   ;;  %s2538_s9 = inlined_call_operand.vmem [shape: f32[1,16], index: 9, kind: input, shape index: {}]   ;;  %s2539_s10 = inlined_call_operand.vmem [shape: f32[16,16], index: 10, kind: input, shape index: {}]   ;;  %s2540_s11 = inlined_call_operand.vmem [shape: f32[1,16], index: 11, kind: input, shape index: {}]   ;;  %s2541_s12 = inlined_call_operand.vmem [shape: f32[1,16], index: 12, kind: input, shape index: {}]   ;;  %s2542_s13 = inlined_call_operand.vmem [shape: f32[1,16], index: 13, kind: input, shape index: {}]   ;;  %s2543_s14 = inlined_call_operand.vmem [shape: f32[4,64,16], index: 14, kind: output, shape index: {}]  }
   0x1 LB: > { %s1707_s30 = sadd.s32 4294967295, %s2026_s29   ;;  %p1711_p0 = scmp.ge.s32.totalorder %s2026_s29, 1  ;;  %s2026_s29 = sphi %s2107_s29, %s24_s29  }
   0x2   : > { %p412_p1 = scmp.lt.s32.totalorder %s2026_s29, 5 }
   0x4   : > { %p413_p2 = pnand %p1711_p0, %p412_p1 }
   0x5   : > { %v476_v0 = vld [vmem:[%s2531_s2] sm:$0xff] (!%p413_p2)  ;;  %v477_v1 = vld [vmem:[%s2531_s2 + $0x8] sm:$0xff] (!%p413_p2)  ;;  %p458_p3 = scmp.lt.s32.totalorder (!%p413_p2), %s1707_s30, 3  ;;  %vm485_vm0 = vcmask (!%p413_p2), 130048   ;;  %vm2029_vm1 = vmmov (!%p413_p2), 0   ;;  %vm999_vm2 = vcmask (!%p413_p2), 523264  }
   0x6   : > { %416 = sbr.rel (%p413_p2) target bundleno = 2227 (0x8b3), region = 76  ;;  %v750_v2 = vld [vmem:[%s2535_s6] sm:$0xff] (!%p413_p2)  ;;  %v1912_v3 = vpack.c.bf16 (!%p413_p2), %v477_v1, %v476_v0  ;;  %v751_v4 = vld [vmem:[%s2535_s6 + $0x8] sm:$0xff] (!%p413_p2)  ;;  %vm1175_vm3 = vcmask (!%p413_p2), 64512   ;;  %vm1946_vm4 = vmpackc.low (!%p413_p2), %vm485_vm0, %vm485_vm0 }
   0x7   : > { %v1916_v5 = vpack.c.bf16 (!%p413_p2), %v751_v4, %v750_v2  ;;  %v1716_v14 = vld [vmem:[%s2532_s3] ss:$0 sm:$0xff] (!%p413_p2) }
   0x8   : > { %1913 = vmatprep.subr.bf16.mxu0 (!%p413_p2), %v1912_v3  ;;  %v1727_v37 = vld [vmem:[%s2536_s7] ss:$0 sm:$0xff] (!%p413_p2) }
   0x9   : > { %1915 = vmatpush3.bf16.msra.mxu0 (!%p413_p2), %v1912_v3  ;;  %1917 = vmatprep.subr.bf16.mxu1 (!%p413_p2), %v1916_v5 }
   0xa   : > { %1919 = vmatpush3.bf16.msra.mxu1 (!%p413_p2), %v1916_v5 }
   0xd   : > { %s2545_s30 = smov (!%p458_p3, %s1707_s30), 3 }
   0xe   : > { %s1758_s23 = sshll.u32 %s2545_s30, 6 }
   0xf   : > { %s462_s26 = scalar_lea.vmem %s2529_s0, %s1758_s23  ;;  %s2501_s27 = scalar_lea.vmem %s2543_s14, %s1758_s23 }
  0x10   : > { %v2135_v6 = vld [vmem:[%s462_s26] sm:$0xff]  ;;  %v2137_v7 = vld [vmem:[%s462_s26 + $0x8] sm:$0xff]  ;;  %v2139_v8 = vld [vmem:[%s462_s26 + $0x10] sm:$0xff] }
  0x11   : > { %1818 = vmatprep.mubr.msk.f32.mxu0 %vm485_vm0, %v2135_v6  ;;  %1834 = vmatprep.mubr.msk.f32.mxu1 %vm485_vm0, %v2135_v6  ;;  %v2151_v9 = vld [vmem:[%s462_s26 + $0x18] sm:$0xff]  ;;  %v2155_v10 = vld [vmem:[%s462_s26 + $0x20] sm:$0xff]  ;;  %v2163_v11 = vld [vmem:[%s462_s26 + $0x28] sm:$0xff] }
  0x12   : > { %1819 = vmatmul.mubr.msk.f32.vlgmr.msra.gmra.mrb[0].mxu0 %vm485_vm0, %v2137_v7  ;;  %1835 = vmatmul.mubr.msk.f32.vlgmr.msra.gmra.mrb[0].mxu1 %vm485_vm0, %v2137_v7  ;;  %v2167_v12 = vld [vmem:[%s462_s26 + $0x30] sm:$0xff]  ;;  %v2175_v13 = vld [vmem:[%s462_s26 + $0x38] sm:$0xff] }
  0x13   : > { %1821 = vmatprep.mubr.msk.f32.mxu0 %vm485_vm0, %v2139_v8  ;;  %1837 = vmatprep.mubr.msk.f32.mxu1 %vm485_vm0, %v2139_v8 }
  0x16   : > { %1822 = vmatmul.mubr.msk.f32.gmra.mrb[2].mxu0 %vm485_vm0, %v2151_v9  ;;  %1838 = vmatmul.mubr.msk.f32.gmra.mrb[2].mxu1 %vm485_vm0, %v2151_v9 }
  0x17   : > { %1824 = vmatprep.mubr.msk.f32.mxu0 %vm485_vm0, %v2155_v10  ;;  %1840 = vmatprep.mubr.msk.f32.mxu1 %vm485_vm0, %v2155_v10 }
  0x1a   : > { %1825 = vmatmul.mubr.msk.f32.gmra.mrb[4].mxu0 %vm485_vm0, %v2163_v11  ;;  %1841 = vmatmul.mubr.msk.f32.gmra.mrb[4].mxu1 %vm485_vm0, %v2163_v11 }
  0x1b   : > { %1827 = vmatprep.mubr.msk.f32.mxu0 %vm485_vm0, %v2167_v12  ;;  %1843 = vmatprep.mubr.msk.f32.mxu1 %vm485_vm0, %v2167_v12 }
  0x1e   : > { %1828 = vmatmul.mubr.msk.f32.gmra.mrb[6].mxu0 %vm485_vm0, %v2175_v13  ;;  %1844 = vmatmul.mubr.msk.f32.gmra.mrb[6].mxu1 %vm485_vm0, %v2175_v13 }
  0xe5   : > { %v1820_v15 = vpop.f32.mrb[0].mxu0  ;;  %v1836_v16 = vpop.f32.mrb[0].mxu1 }
  0xe6   : > { %v576_v17 = vpop.f32.mrb[1].mxu0  ;;  %v825_v18 = vpop.f32.mrb[1].mxu1  ;;  %v2188_v20 = vadd.f32 %v1820_v15, %v1716_v14  ;;  %v2215_v48 = vadd.f32 %v1836_v16, %v1727_v37 }
  0xe7   : > { %v2186_v19 = vadd.f32 %v1716_v14, %v576_v17  ;;  %v2212_v46 = vadd.f32 %v1727_v37, %v825_v18 }
  0xe8   : > { %v620_v30 = vsel %vm485_vm0, %v2188_v20, 0.0  ;;  %v869_v53 = vsel %vm485_vm0, %v2215_v48, 0.0 }
  0xe9   : > { %v1823_v21 = vpop.f32.mrb[2].mxu0  ;;  %v617_v22 = vsel %vm485_vm0, %v2186_v19, 0.0  ;;  %v1839_v23 = vpop.f32.mrb[2].mxu1  ;;  %v866_v51 = vsel %vm485_vm0, %v2212_v46, 0.0 }
  0xea   : > { %v2192_v24 = vadd.f32 %v1823_v21, %v1716_v14  ;;  %v586_v25 = vpop.f32.mrb[3].mxu0  ;;  %618 = vadd.xlane.f32.xlu0 %v617_v22  ;;  %v835_v26 = vpop.f32.mrb[3].mxu1  ;;  %v2223_v52 = vadd.f32 %v1839_v23, %v1727_v37 }
  0xeb   : > { %v2194_v27 = vadd.f32 %v1716_v14, %v586_v25  ;;  %v2219_v50 = vadd.f32 %v1727_v37, %v835_v26 }
  0xec   : > { %v626_v28 = vsel %vm485_vm0, %v2192_v24, 0.0  ;;  %v875_v57 = vsel %vm485_vm0, %v2223_v52, 0.0 }
  0xed   : > { %627 = vadd.xlane.f32.xlu1 %v626_v28  ;;  %v1826_v29 = vpop.f32.mrb[4].mxu0  ;;  %v1842_v31 = vpop.f32.mrb[4].mxu1  ;;  %v623_v36 = vsel %vm485_vm0, %v2194_v27, 0.0  ;;  %v872_v55 = vsel %vm485_vm0, %v2219_v50, 0.0 }
  0xee   : > { %v2200_v32 = vadd.f32 %v1826_v29, %v1716_v14  ;;  %v596_v33 = vpop.f32.mrb[5].mxu0  ;;  %621 = vadd.xlane.f32.xlu0 %v620_v30  ;;  %v845_v34 = vpop.f32.mrb[5].mxu1  ;;  %v2231_v56 = vadd.f32 %v1842_v31, %v1727_v37 }
  0xef   : > { %v597_v35 = vadd.f32 %v1716_v14, %v596_v33  ;;  %v2227_v54 = vadd.f32 %v1727_v37, %v845_v34 }
  0xf0   : > { %v632_v43 = vsel %vm485_vm0, %v2200_v32, 0.0  ;;  %v881_v61 = vsel %vm485_vm0, %v2231_v56, 0.0 }
  0xf1   : > { %v1829_v38 = vpop.f32.mrb[6].mxu0  ;;  %624 = vadd.xlane.f32.xlu1 %v623_v36  ;;  %v629_v39 = vsel %vm485_vm0, %v597_v35, 0.0  ;;  %v1845_v40 = vpop.f32.mrb[6].mxu1  ;;  %v878_v59 = vsel %vm485_vm0, %v2227_v54, 0.0 }
  0xf2   : > { %v2208_v41 = vadd.f32 %v1829_v38, %v1716_v14  ;;  %v606_v42 = vpop.f32.mrb[7].mxu0  ;;  %630 = vadd.xlane.f32.xlu0 %v629_v39  ;;  %v855_v44 = vpop.f32.mrb[7].mxu1  ;;  %v2239_v60 = vadd.f32 %v1845_v40, %v1727_v37 }
  0xf3   : > { %v607_v45 = vadd.f32 %v1716_v14, %v606_v42  ;;  %v2235_v58 = vadd.f32 %v1727_v37, %v855_v44 }
  0xf4   : > { %v638_v49 = vsel %vm485_vm0, %v2208_v41, 0.0  ;;  %v887_v63 = vsel %vm485_vm0, %v2239_v60, 0.0 }
  0xf5   : > { %633 = vadd.xlane.f32.xlu1 %v632_v43  ;;  %v635_v47 = vsel %vm485_vm0, %v607_v45, 0.0  ;;  %v884_v62 = vsel %vm485_vm0, %v2235_v58, 0.0 }
  0xf6   : > { %636 = vadd.xlane.f32.xlu0 %v635_v47 }
  0xf9   : > { %639 = vadd.xlane.f32.xlu1 %v638_v49 }
  0xfa   : > { %867 = vadd.xlane.f32.xlu0 %v866_v51 }
  0xfd   : > { %870 = vadd.xlane.f32.xlu1 %v869_v53 }
  0xfe   : > { %873 = vadd.xlane.f32.xlu0 %v872_v55 }
 0x101   : > { %876 = vadd.xlane.f32.xlu1 %v875_v57 }
 0x102   : > { %879 = vadd.xlane.f32.xlu0 %v878_v59 }
 0x105   : > { %882 = vadd.xlane.f32.xlu1 %v881_v61 }
 0x106   : > { %885 = vadd.xlane.f32.xlu0 %v884_v62 }
 0x109   : > { %888 = vadd.xlane.f32.xlu1 %v887_v63 }
 0x177   : > { %v619_v0 = vpop.xlane.xlu0 %618 }
 0x178   : > { %v642_v1 = vmul.f32 0.0625, %v619_v0 }
 0x17a   : > { %v2248_v2 = vsub.f32 %v2186_v19, %v642_v1  ;;  %v628_v3 = vpop.xlane.xlu1 %627 }
 0x17b   : > { %v645_v4 = vmul.f32 0.0625, %v628_v3  ;;  %v622_v5 = vpop.xlane.xlu0 %621 }
 0x17c   : > { %v643_v14 = vmul.f32 0.0625, %v622_v5  ;;  %v658_v15 = vmul.f32 %v2248_v2, %v2248_v2 }
 0x17d   : > { %v2253_v16 = vsub.f32 %v2192_v24, %v645_v4 }
 0x17e   : > { %v2256_v17 = vsub.f32 %v2188_v20, %v643_v14  ;;  %v625_v18 = vpop.xlane.xlu1 %624  ;;  %v666_v21 = vsel %vm485_vm0, %v658_v15, 0.0 }
 0x17f   : > { %v644_v22 = vmul.f32 0.0625, %v625_v18  ;;  %667 = vadd.xlane.f32.xlu0 %v666_v21  ;;  %v631_v19 = vpop.xlane.xlu0 %630  ;;  %v661_v20 = vmul.f32 %v2253_v16, %v2253_v16 }
 0x180   : > { %v646_v23 = vmul.f32 0.0625, %v631_v19  ;;  %v659_v25 = vmul.f32 %v2256_v17, %v2256_v17 }
 0x181   : > { %v2262_v26 = vsub.f32 %v2194_v27, %v644_v22  ;;  %v675_v39 = vsel %vm485_vm0, %v661_v20, 0.0 }
 0x182   : > { %v2264_v28 = vsub.f32 %v597_v35, %v646_v23  ;;  %v634_v24 = vpop.xlane.xlu1 %633  ;;  %v669_v29 = vsel %vm485_vm0, %v659_v25, 0.0 }
 0x183   : > { %v647_v30 = vmul.f32 0.0625, %v634_v24  ;;  %670 = vadd.xlane.f32.xlu1 %v669_v29  ;;  %v637_v31 = vpop.xlane.xlu0 %636  ;;  %v660_v33 = vmul.f32 %v2262_v26, %v2262_v26 }
 0x184   : > { %v648_v34 = vmul.f32 0.0625, %v637_v31  ;;  %v662_v35 = vmul.f32 %v2264_v28, %v2264_v28 }
 0x185   : > { %v2272_v36 = vsub.f32 %v2200_v32, %v647_v30  ;;  %v672_v27 = vsel %vm485_vm0, %v660_v33, 0.0 }
 0x186   : > { %v2277_v37 = vsub.f32 %v607_v45, %v648_v34  ;;  %v640_v38 = vpop.xlane.xlu1 %639  ;;  %673 = vadd.xlane.f32.xlu0 %v672_v27  ;;  %v678_v47 = vsel %vm485_vm0, %v662_v35, 0.0 }
 0x187   : > { %v649_v40 = vmul.f32 0.0625, %v640_v38  ;;  %676 = vadd.xlane.f32.xlu1 %v675_v39  ;;  %v868_v42 = vpop.xlane.xlu0 %867  ;;  %v663_v43 = vmul.f32 %v2272_v36, %v2272_v36 }
 0x188   : > { %v890_v44 = vmul.f32 0.0625, %v868_v42  ;;  %v664_v45 = vmul.f32 %v2277_v37, %v2277_v37  ;;  %v2030_v42 = vmov 0.0  }
 0x189   : > { %v2283_v32 = vsub.f32 %v2208_v41, %v649_v40  ;;  %v681_v49 = vsel %vm485_vm0, %v663_v43, 0.0  ;;  %1862 = vmatprep.mubr.msk.f32.mxu0 %vm2029_vm1, %v2030_v42  ;;  %1881 = vmatprep.mubr.msk.f32.mxu1 %vm2029_vm1, %v2030_v42 }
 0x18a   : > { %v2290_v51 = vsub.f32 %v2212_v46, %v890_v44  ;;  %v871_v53 = vpop.xlane.xlu1 %870  ;;  %679 = vadd.xlane.f32.xlu0 %v678_v47  ;;  %v684_v62 = vsel %vm485_vm0, %v664_v45, 0.0 }
 0x18b   : > { %v891_v55 = vmul.f32 0.0625, %v871_v53  ;;  %682 = vadd.xlane.f32.xlu1 %v681_v49  ;;  %v874_v57 = vpop.xlane.xlu0 %873  ;;  %v665_v59 = vmul.f32 %v2283_v32, %v2283_v32 }
 0x18c   : > { %v892_v41 = vmul.f32 0.0625, %v874_v57  ;;  %v906_v46 = vmul.f32 %v2290_v51, %v2290_v51 }
 0x18d   : > { %v2295_v61 = vsub.f32 %v2215_v48, %v891_v55  ;;  %v687_v63 = vsel %vm485_vm0, %v665_v59, 0.0 }
 0x18e   : > { %v2302_v0 = vsub.f32 %v2219_v50, %v892_v41  ;;  %v877_v1 = vpop.xlane.xlu1 %876  ;;  %685 = vadd.xlane.f32.xlu0 %v684_v62  ;;  %v914_v15 = vsel %vm485_vm0, %v906_v46, 0.0 }
 0x18f   : > { %v893_v3 = vmul.f32 0.0625, %v877_v1  ;;  %688 = vadd.xlane.f32.xlu1 %v687_v63  ;;  %v880_v4 = vpop.xlane.xlu0 %879  ;;  %v907_v5 = vmul.f32 %v2295_v61, %v2295_v61 }
 0x190   : > { %v894_v48 = vmul.f32 0.0625, %v880_v4  ;;  %v908_v50 = vmul.f32 %v2302_v0, %v2302_v0 }
 0x191   : > { %v2307_v14 = vsub.f32 %v2223_v52, %v893_v3  ;;  %v917_v18 = vsel %vm485_vm0, %v907_v5, 0.0 }
 0x192   : > { %v2314_v21 = vsub.f32 %v2227_v54, %v894_v48  ;;  %v883_v22 = vpop.xlane.xlu1 %882  ;;  %915 = vadd.xlane.f32.xlu0 %v914_v15  ;;  %v920_v29 = vsel %vm485_vm0, %v908_v50, 0.0 }
 0x193   : > { %v895_v19 = vmul.f32 0.0625, %v883_v22  ;;  %918 = vadd.xlane.f32.xlu1 %v917_v18  ;;  %v886_v23 = vpop.xlane.xlu0 %885  ;;  %v909_v25 = vmul.f32 %v2307_v14, %v2307_v14 }
 0x194   : > { %v896_v52 = vmul.f32 0.0625, %v886_v23  ;;  %v910_v54 = vmul.f32 %v2314_v21, %v2314_v21  ;;  %v2351_v23 = vld [vmem:[%s2533_s4] ss:$0 sm:$0xff] }
 0x195   : > { %v2319_v24 = vsub.f32 %v2231_v56, %v895_v19  ;;  %v923_v20 = vsel %vm485_vm0, %v909_v25, 0.0 }
 0x196   : > { %v2326_v30 = vsub.f32 %v2235_v58, %v896_v52  ;;  %v889_v31 = vpop.xlane.xlu1 %888  ;;  %921 = vadd.xlane.f32.xlu0 %v920_v29  ;;  %v926_v27 = vsel %vm485_vm0, %v910_v54, 0.0 }
 0x197   : > { %v897_v33 = vmul.f32 0.0625, %v889_v31  ;;  %924 = vadd.xlane.f32.xlu1 %v923_v20  ;;  %v911_v34 = vmul.f32 %v2319_v24, %v2319_v24 }
 0x198   : > { %v912_v38 = vmul.f32 %v2326_v30, %v2326_v30 }
 0x199   : > { %v2331_v56 = vsub.f32 %v2239_v60, %v897_v33  ;;  %v929_v35 = vsel %vm485_vm0, %v911_v34, 0.0  ;;  %v2028_v60 = vmov 0.0|0.0  }
 0x19a   : > { %927 = vadd.xlane.f32.xlu0 %v926_v27  ;;  %v932_v39 = vsel %vm485_vm0, %v912_v38, 0.0  ;;  %1920 = vmatprep.subr.bf16.mxu0 %v2028_v60  ;;  %v2358_v27 = vld [vmem:[%s2534_s5] ss:$0 sm:$0xff] }
 0x19b   : > { %930 = vadd.xlane.f32.xlu1 %v929_v35  ;;  %v913_v58 = vmul.f32 %v2331_v56, %v2331_v56  ;;  %1932 = vmatprep.subr.bf16.mxu1 %v2028_v60 }
 0x19d   : > { %v935_v40 = vsel %vm485_vm0, %v913_v58, 0.0 }
 0x19e   : > { %933 = vadd.xlane.f32.xlu0 %v932_v39 }
 0x19f   : > { %936 = vadd.xlane.f32.xlu1 %v935_v40 }
 0x20c   : > { %v668_v43 = vpop.xlane.xlu0 %667 }
 0x20d   : > { %v690_v44 = vmul.f32 0.0625, %v668_v43 }
 0x20f   : > { %v698_v47 = vadd.f32 1e-05, %v690_v44 }
 0x210   : > { %v671_v49 = vpop.xlane.xlu1 %670 }
 0x211   : > { %1964 = vrsqrt.f32 %v698_v47  ;;  %v691_v45 = vmul.f32 0.0625, %v671_v49 }
 0x213   : > { %v699_v53 = vadd.f32 1e-05, %v691_v45  ;;  %v674_v55 = vpop.xlane.xlu0 %673 }
 0x214   : > { %v692_v57 = vmul.f32 0.0625, %v674_v55  ;;  %v677_v59 = vpop.xlane.xlu1 %676 }
 0x215   : > { %1966 = vrsqrt.f32 %v699_v53  ;;  %v693_v41 = vmul.f32 0.0625, %v677_v59 }
 0x216   : > { %v700_v62 = vadd.f32 1e-05, %v692_v57 }
 0x217   : > { %v701_v63 = vadd.f32 1e-05, %v693_v41  ;;  %v680_v46 = vpop.xlane.xlu0 %679 }
 0x218   : > { %1968 = vrsqrt.f32 %v700_v62  ;;  %v694_v1 = vmul.f32 0.0625, %v680_v46  ;;  %v683_v3 = vpop.xlane.xlu1 %682 }
 0x219   : > { %1970 = vrsqrt.f32 %v701_v63  ;;  %v695_v4 = vmul.f32 0.0625, %v683_v3 }
 0x21a   : > { %v702_v5 = vadd.f32 1e-05, %v694_v1 }
 0x21b   : > { %v1965_v48 = vpop.eup %1964  ;;  %v703_v15 = vadd.f32 1e-05, %v695_v4  ;;  %v686_v18 = vpop.xlane.xlu0 %685 }
 0x21c   : > { %v714_v50 = vmul.f32 %v1965_v48, %v2248_v2  ;;  %1972 = vrsqrt.f32 %v702_v5  ;;  %v696_v22 = vmul.f32 0.0625, %v686_v18  ;;  %v689_v19 = vpop.xlane.xlu1 %688 }
 0x21d   : > { %1974 = vrsqrt.f32 %v703_v15  ;;  %v697_v25 = vmul.f32 0.0625, %v689_v19 }
 0x21e   : > { %v704_v52 = vadd.f32 1e-05, %v696_v22  ;;  %v728_v31 = vmul.f32 %v2351_v23, %v714_v50 }
 0x21f   : > { %v1967_v29 = vpop.eup %1966  ;;  %v705_v20 = vadd.f32 1e-05, %v697_v25  ;;  %v916_v54 = vpop.xlane.xlu0 %915 }
 0x220   : > { %v715_v33 = vmul.f32 %v1967_v29, %v2256_v17  ;;  %1976 = vrsqrt.f32 %v704_v52  ;;  %v938_v2 = vmul.f32 0.0625, %v916_v54  ;;  %v919_v34 = vpop.xlane.xlu1 %918  ;;  %v742_v17 = vadd.f32 %v2358_v27, %v728_v31 }
 0x221   : > { %1978 = vrsqrt.f32 %v705_v20  ;;  %v939_v35 = vmul.f32 0.0625, %v919_v34 }
 0x222   : > { %v1969_v38 = vpop.eup %1968  ;;  %v946_v58 = vadd.f32 1e-05, %v938_v2  ;;  %v729_v39 = vmul.f32 %v2351_v23, %v715_v33 }
 0x223   : > { %v1971_v40 = vpop.eup %1970  ;;  %v716_v43 = vmul.f32 %v1969_v38, %v2262_v26  ;;  %v947_v44 = vadd.f32 1e-05, %v939_v35  ;;  %v922_v47 = vpop.xlane.xlu0 %921 }
 0x224   : > { %v717_v49 = vmul.f32 %v1971_v40, %v2253_v16  ;;  %1980 = vrsqrt.f32 %v946_v58  ;;  %v940_v45 = vmul.f32 0.0625, %v922_v47  ;;  %v925_v53 = vpop.xlane.xlu1 %924  ;;  %v743_v55 = vadd.f32 %v2358_v27, %v729_v39 }
 0x225   : > { %1982 = vrsqrt.f32 %v947_v44  ;;  %v941_v57 = vmul.f32 0.0625, %v925_v53  ;;  %v730_v59 = vmul.f32 %v2351_v23, %v716_v43 }
 0x226   : > { %v1973_v41 = vpop.eup %1972  ;;  %v948_v62 = vadd.f32 1e-05, %v940_v45  ;;  %v1921_v63 = vpack.c.bf16 %v743_v55, %v742_v17  ;;  %v731_v26 = vmul.f32 %v2351_v23, %v717_v49 }
 0x227   : > { %v1975_v46 = vpop.eup %1974  ;;  %v718_v1 = vmul.f32 %v1973_v41, %v2264_v28  ;;  %v949_v3 = vadd.f32 1e-05, %v941_v57  ;;  %v928_v4 = vpop.xlane.xlu0 %927  ;;  %v744_v16 = vadd.f32 %v2358_v27, %v730_v59 }
 0x228   : > { %v719_v5 = vmul.f32 %v1975_v46, %v2272_v36  ;;  %1984 = vrsqrt.f32 %v948_v62  ;;  %v942_v48 = vmul.f32 0.0625, %v928_v4  ;;  %v931_v15 = vpop.xlane.xlu1 %930  ;;  %1922 = vmatpush3.bf16.msra.mxu0 %v1921_v63  ;;  %v745_v18 = vadd.f32 %v2358_v27, %v731_v26 }
 0x229   : > { %1986 = vrsqrt.f32 %v949_v3  ;;  %v943_v50 = vmul.f32 0.0625, %v931_v15  ;;  %1923 = vmatprep.subr.bf16.mxu0 %v2028_v60  ;;  %v732_v22 = vmul.f32 %v2351_v23, %v718_v1 }
 0x22a   : > { %v1977_v19 = vpop.eup %1976  ;;  %v950_v28 = vadd.f32 1e-05, %v942_v48  ;;  %v1924_v25 = vpack.c.bf16 %v745_v18, %v744_v16  ;;  %v733_v52 = vmul.f32 %v2351_v23, %v719_v5 }
 0x22b   : > { %v1979_v29 = vpop.eup %1978  ;;  %v720_v36 = vmul.f32 %v1977_v19, %v2277_v37  ;;  %v951_v20 = vadd.f32 1e-05, %v943_v50  ;;  %v934_v54 = vpop.xlane.xlu0 %933  ;;  %v746_v31 = vadd.f32 %v2358_v27, %v732_v22 }
 0x22c   : > { %v721_v33 = vmul.f32 %v1979_v29, %v2283_v32  ;;  %1988 = vrsqrt.f32 %v950_v28  ;;  %v944_v2 = vmul.f32 0.0625, %v934_v54  ;;  %v937_v34 = vpop.xlane.xlu1 %936  ;;  %1925 = vmatpush3.bf16.msra.mxu0 %v1924_v25  ;;  %v747_v35 = vadd.f32 %v2358_v27, %v733_v52  ;;  %v1736_v32 = vld [vmem:[%s2537_s8] ss:$0 sm:$0xff] }
 0x22d   : > { %1990 = vrsqrt.f32 %v951_v20  ;;  %v945_v38 = vmul.f32 0.0625, %v937_v34  ;;  %1926 = vmatprep.subr.bf16.mxu0 %v2028_v60  ;;  %v734_v58 = vmul.f32 %v2351_v23, %v720_v36 }
 0x22e   : > { %v1981_v39 = vpop.eup %1980  ;;  %v952_v37 = vadd.f32 1e-05, %v944_v2  ;;  %v1927_v40 = vpack.c.bf16 %v747_v35, %v746_v31  ;;  %v735_v43 = vmul.f32 %v2351_v23, %v721_v33  ;;  %v1737_v23 = vld [vmem:[%s2538_s9] ss:$0 sm:$0xff] }
 0x22f   : > { %v1983_v44 = vpop.eup %1982  ;;  %v962_v47 = vmul.f32 %v1981_v39, %v2290_v51  ;;  %v953_v17 = vadd.f32 1e-05, %v945_v38  ;;  %v748_v49 = vadd.f32 %v2358_v27, %v734_v58 }
 0x230   : > { %v963_v45 = vmul.f32 %v1983_v44, %v2295_v61  ;;  %1992 = vrsqrt.f32 %v952_v37  ;;  %1928 = vmatpush3.bf16.msra.mxu0 %v1927_v40  ;;  %v749_v53 = vadd.f32 %v2358_v27, %v735_v43  ;;  %v998_v27 = vld [vmem:[%s2530_s1] sm:$0xff] }
 0x231   : > { %1994 = vrsqrt.f32 %v953_v17  ;;  %1929 = vmatprep.subr.bf16.mxu0 %v2028_v60  ;;  %v976_v55 = vmul.f32 %v1736_v32, %v962_v47 }
 0x232   : > { %v1985_v57 = vpop.eup %1984  ;;  %v1930_v59 = vpack.c.bf16 %v749_v53, %v748_v49  ;;  %v977_v51 = vmul.f32 %v1736_v32, %v963_v45 }
 0x233   : > { %v1987_v41 = vpop.eup %1986  ;;  %v964_v62 = vmul.f32 %v1985_v57, %v2302_v0  ;;  %v990_v63 = vadd.f32 %v1737_v23, %v976_v55 }
 0x234   : > { %v965_v61 = vmul.f32 %v1987_v41, %v2307_v14  ;;  %1931 = vmatpush3.bf16.msra.mxu0 %v1930_v59  ;;  %v991_v26 = vadd.f32 %v1737_v23, %v977_v51 }
 0x235   : > { %v978_v46 = vmul.f32 %v1736_v32, %v964_v62 }
 0x236   : > { %v1989_v1 = vpop.eup %1988  ;;  %v1933_v3 = vpack.c.bf16 %v991_v26, %v990_v63  ;;  %v979_v4 = vmul.f32 %v1736_v32, %v965_v61  ;;  %v2031_v61 = vmov 1.0   ;;  %v1373_v26 = vld [vmem:[%s2539_s10 + $0x8] sm:$0xff] }
 0x237   : > { %v1991_v16 = vpop.eup %1990  ;;  %v966_v5 = vmul.f32 %v1989_v1, %v2314_v21  ;;  %1863 = vmatmul.mubr.msk.f32.vlgmr.msra.gmra.mrb[8].mxu0 %vm999_vm2, %v998_v27  ;;  %v992_v0 = vadd.f32 %v1737_v23, %v978_v46  ;;  %v1360_v1 = vlaneseq }
 0x238   : > { %v967_v48 = vmul.f32 %v1991_v16, %v2319_v24  ;;  %1934 = vmatpush3.bf16.msra.mxu1 %v1933_v3  ;;  %v993_v14 = vadd.f32 %v1737_v23, %v979_v4 }
 0x239   : > { %1935 = vmatprep.subr.bf16.mxu1 %v2028_v60  ;;  %v980_v15 = vmul.f32 %v1736_v32, %v966_v5  ;;  %v1361_v3 = vshrl.u32 %v1360_v1, 7 }
 0x23a   : > { %v1993_v18 = vpop.eup %1992  ;;  %v1936_v50 = vpack.c.bf16 %v993_v14, %v992_v0  ;;  %v981_v22 = vmul.f32 %v1736_v32, %v967_v48 }
 0x23b   : > { %v1995_v19 = vpop.eup %1994  ;;  %v968_v28 = vmul.f32 %v1993_v18, %v2326_v30  ;;  %v994_v25 = vadd.f32 %v1737_v23, %v980_v15  ;;  %v1362_v4 = vsub.s32 0, %v1361_v3 }
 0x23c   : > { %v969_v52 = vmul.f32 %v1995_v19, %v2331_v56  ;;  %1937 = vmatpush3.bf16.msra.mxu1 %v1936_v50  ;;  %v995_v21 = vadd.f32 %v1737_v23, %v981_v22 }
 0x23d   : > { %1938 = vmatprep.subr.bf16.mxu1 %v2028_v60  ;;  %v982_v29 = vmul.f32 %v1736_v32, %v968_v28 }
 0x23e   : > { %v1939_v24 = vpack.c.bf16 %v995_v21, %v994_v25  ;;  %v983_v36 = vmul.f32 %v1736_v32, %v969_v52 }
 0x23f   : > { %v996_v20 = vadd.f32 %v1737_v23, %v982_v29 }
 0x240   : > { %1940 = vmatpush3.bf16.msra.mxu1 %v1939_v24  ;;  %v997_v54 = vadd.f32 %v1737_v23, %v983_v36 }
 0x241   : > { %1941 = vmatprep.subr.bf16.mxu1 %v2028_v60 }
 0x242   : > { %v1942_v31 = vpack.c.bf16 %v997_v54, %v996_v20 }
 0x244   : > { %1943 = vmatpush3.bf16.msra.mxu1 %v1942_v31 }
 0x247   : > { %1882 = vmatmul.mubr.msk.f32.vlgmr.msra.gmra.mrb[8].mxu1 %vm999_vm2, %v998_v27  ;;  %v1372_v27 = vld [vmem:[%s2539_s10] sm:$0xff] }
 0x248   : > { %v1948_v46 = vpack.c.bf16 %v1373_v26, %v1372_v27 }
 0x24a   : > { %1949 = vmatprep.subr.bf16.mxu0 %v1948_v46 }
 0x24b   : > { %1951 = vmatpush3.bf16.msra.mxu0 %v1948_v46 }
 0x30a   : > { %v1069_v30 = vpop.f32.mrb[8].mxu0 }
 0x30b   : > { %1143 = vxpose.xlu0.b32.start.end [1/1] (short) (narrow) %v1069_v30, 16  ;;  %v1864_v33 = vpop.f32.mrb[9].mxu0 }
 0x31a   : > { %v1139_v56 = vpop.f32.mrb[8].mxu1 }
 0x31b   : > { %v1883_v2 = vpop.f32.mrb[9].mxu1  ;;  %1884 = vmatprep.subr.mxu1 %v1139_v56 }
 0x31c   : > { %1885 = vmatpush3.msra.mxu1 %v1139_v56 }
 0x31d   : > { %1944 = vmatprep.subr.bf16.mxu1 %v2028_v60 }
 0x38b   : > { %v1159_v34 = vpop.trf.xlu0 }
 0x38c   : > { %1886 = vmatprep.mubr.msk.f32.mxu1 %vm1175_vm3, %v1159_v34 }
 0x38f   : > { %v1160_v35 = vpop.trf.xlu0 }
 0x390   : > { %1887 = vmatmul.mubr.msk.f32.vlgmr.msra.gmra.mrb[10].mxu1 %vm1175_vm3, %v1160_v35 }
 0x391   : > { %1893 = vmatprep.mubr.msk.f32.mxu1 %vm2029_vm1, %v2030_v42 }
 0x463   : > { %v1888_v38 = vpop.f32.mrb[10].mxu1 }
 0x464   : > { %v1248_v58 = vpop.f32.mrb[11].mxu1  ;;  %v1258_v37 = vmul.f32 0.35355338, %v1888_v38 }
 0x465   : > { %v1257_v39 = vmul.f32 0.35355338, %v1248_v58 }
 0x466   : > { %v1262_v43 = vsel %vm485_vm0, %v1258_v37, -inf }
 0x467   : > { %v1259_v40 = vsel %vm485_vm0, %v1257_v39, -inf }
 0x468   : > { %1260 = vmax.xlane.f32.xlu1 %v1259_v40 }
 0x46c   : > { %1263 = vmax.xlane.f32.xlu1 %v1262_v43 }
 0x4f5   : > { %v1261_v32 = vpop.xlane.xlu1 %1260 }
 0x4f6   : > { %v1265_v60 = vsub.f32 %v1257_v39, %v1261_v32 }
 0x4f8   : > { %v1267_v44 = vmul.f32 1.442695, %v1265_v60 }
 0x4f9   : > { %v1264_v47 = vpop.xlane.xlu1 %1263 }
 0x4fa   : > { %1996 = vpow2.f32 %v1267_v44  ;;  %v1266_v17 = vsub.f32 %v1258_v37, %v1264_v47 }
 0x4fc   : > { %v1269_v49 = vmul.f32 1.442695, %v1266_v17 }
 0x4fe   : > { %1998 = vpow2.f32 %v1269_v49 }
 0x504   : > { %v1997_v45 = vpop.eup %1996 }
 0x505   : > { %v1271_v42 = vsel %vm485_vm0, %v1997_v45, 0.0 }
 0x506   : > { %1272 = vadd.xlane.f32.xlu1 %v1271_v42 }
 0x508   : > { %v1999_v53 = vpop.eup %1998 }
 0x509   : > { %v1274_v23 = vsel %vm485_vm0, %v1999_v53, 0.0 }
 0x50a   : > { %1275 = vadd.xlane.f32.xlu1 %v1274_v23 }
 0x593   : > { %v1273_v55 = vpop.xlane.xlu1 %1272 }
 0x594   : > { %2000 = vrcp.f32 %v1273_v55 }
 0x597   : > { %v1276_v57 = vpop.xlane.xlu1 %1275 }
 0x598   : > { %2002 = vrcp.f32 %v1276_v57 }
 0x59e   : > { %v2001_v59 = vpop.eup %2000 }
 0x59f   : > { %v1278_v41 = vmul.f32 %v2001_v59, %v1997_v45 }
 0x5a2   : > { %v2003_v51 = vpop.eup %2002 }
 0x5a3   : > { %v1280_v62 = vmul.f32 %v2003_v51, %v1999_v53 }
 0x5a5   : > { %v1945_v63 = vpack.c.bf16 %v1280_v62, %v1278_v41 }
 0x5a7   : > { %1947 = vmatpush3.bf16.xpose.msk.msra.mxu1 %vm1946_vm4, %v1945_v63 }
 0x5ae   : > { %1894 = vmatmul.mubr.msk.f32.vlgmr.msra.gmra.mrb[12].mxu1 %vm485_vm0, %v2031_v61 }
 0x681   : > { %v1356_v16 = vpop.f32.mrb[12].mxu1 }
 0x682   : > { %v1363_v5 = vrot.slane %v1356_v16, %v1362_v4  ;;  %v1895_v0 = vpop.f32.mrb[13].mxu1 }
 0x684   : > { %v1364_v48 = vmul.f32 %v1363_v5, %v2135_v6  ;;  %v1365_v14 = vmul.f32 %v1363_v5, %v2137_v7  ;;  %v1366_v15 = vmul.f32 %v1363_v5, %v2139_v8  ;;  %v1367_v18 = vmul.f32 %v1363_v5, %v2151_v9  ;;  %v1745_v9 = vld [vmem:[%s2540_s11] ss:$0 sm:$0xff] }
 0x685   : > { %v1368_v50 = vmul.f32 %v1363_v5, %v2155_v10  ;;  %v1369_v6 = vmul.f32 %v1363_v5, %v2163_v11  ;;  %v1370_v7 = vmul.f32 %v1363_v5, %v2167_v12  ;;  %v1371_v8 = vmul.f32 %v1363_v5, %v2175_v13 }
 0x686   : > { %1900 = vmatprep.mubr.msk.f32.mxu0 %vm485_vm0, %v1364_v48 }
 0x687   : > { %1901 = vmatmul.mubr.msk.f32.vlgmr.msra.gmra.mrb[10].mxu0 %vm485_vm0, %v1365_v14 }
 0x688   : > { %1903 = vmatprep.mubr.msk.f32.mxu0 %vm485_vm0, %v1366_v15 }
 0x68b   : > { %1904 = vmatmul.mubr.msk.f32.gmra.mrb[12].mxu0 %vm485_vm0, %v1367_v18 }
 0x68c   : > { %1906 = vmatprep.mubr.msk.f32.mxu0 %vm485_vm0, %v1368_v50 }
 0x68f   : > { %1907 = vmatmul.mubr.msk.f32.gmra.mrb[14].mxu0 %vm485_vm0, %v1369_v6 }
 0x690   : > { %1909 = vmatprep.mubr.msk.f32.mxu0 %vm485_vm0, %v1370_v7 }
 0x693   : > { %1910 = vmatmul.mubr.msk.f32.gmra.mrb[16].mxu0 %vm485_vm0, %v1371_v8 }
 0x75a   : > { %v1902_v10 = vpop.f32.mrb[10].mxu0 }
 0x75b   : > { %v1477_v22 = vadd.f32 %v1902_v10, %v1745_v9  ;;  %v1471_v19 = vpop.f32.mrb[11].mxu0 }
 0x75c   : > { %v1472_v28 = vadd.f32 %v1745_v9, %v1471_v19 }
 0x75d   : > { %v1515_v11 = vsel %vm485_vm0, %v1477_v22, 0.0 }
 0x75e   : > { %1516 = vadd.xlane.f32.xlu1 %v1515_v11  ;;  %v1905_v12 = vpop.f32.mrb[12].mxu0  ;;  %v1512_v21 = vsel %vm485_vm0, %v1472_v28, 0.0 }
 0x75f   : > { %v1481_v25 = vpop.f32.mrb[13].mxu0  ;;  %v1487_v52 = vadd.f32 %v1905_v12, %v1745_v9 }
 0x760   : > { %v1482_v24 = vadd.f32 %v1745_v9, %v1481_v25 }
 0x761   : > { %v1521_v36 = vsel %vm485_vm0, %v1487_v52, 0.0 }
 0x762   : > { %v1908_v29 = vpop.f32.mrb[14].mxu0  ;;  %1513 = vadd.xlane.f32.xlu1 %v1512_v21  ;;  %v1518_v30 = vsel %vm485_vm0, %v1482_v24, 0.0 }
 0x763   : > { %v1491_v13 = vpop.f32.mrb[15].mxu0  ;;  %v1497_v31 = vadd.f32 %v1908_v29, %v1745_v9 }
 0x764   : > { %v1492_v33 = vadd.f32 %v1745_v9, %v1491_v13 }
 0x765   : > { %v1527_v56 = vsel %vm485_vm0, %v1497_v31, 0.0 }
 0x766   : > { %v1911_v20 = vpop.f32.mrb[16].mxu0  ;;  %1522 = vadd.xlane.f32.xlu1 %v1521_v36  ;;  %v1524_v34 = vsel %vm485_vm0, %v1492_v33, 0.0  ;;  %v1754_v36 = vld [vmem:[%s2541_s12] ss:$0 sm:$0xff] }
 0x767   : > { %v1501_v54 = vpop.f32.mrb[17].mxu0  ;;  %v1507_v35 = vadd.f32 %v1911_v20, %v1745_v9 }
 0x768   : > { %v1502_v2 = vadd.f32 %v1745_v9, %v1501_v54 }
 0x769   : > { %v1533_v58 = vsel %vm485_vm0, %v1507_v35, 0.0 }
 0x76a   : > { %1519 = vadd.xlane.f32.xlu1 %v1518_v30  ;;  %v1530_v38 = vsel %vm485_vm0, %v1502_v2, 0.0  ;;  %v1755_v30 = vld [vmem:[%s2542_s13] ss:$0 sm:$0xff] }
 0x76e   : > { %1528 = vadd.xlane.f32.xlu1 %v1527_v56 }
 0x772   : > { %1525 = vadd.xlane.f32.xlu1 %v1524_v34 }
 0x776   : > { %1531 = vadd.xlane.f32.xlu1 %v1530_v38 }
 0x77a   : > { %1534 = vadd.xlane.f32.xlu1 %v1533_v58 }
 0x7eb   : > { %v1517_v39 = vpop.xlane.xlu1 %1516 }
 0x7ec   : > { %v1537_v37 = vmul.f32 0.0625, %v1517_v39 }
 0x7ee   : > { %v2449_v40 = vsub.f32 %v1477_v22, %v1537_v37 }
 0x7ef   : > { %v1514_v43 = vpop.xlane.xlu1 %1513 }
 0x7f0   : > { %v1536_v32 = vmul.f32 0.0625, %v1514_v43  ;;  %v1553_v60 = vmul.f32 %v2449_v40, %v2449_v40 }
 0x7f2   : > { %v2453_v44 = vsub.f32 %v1472_v28, %v1536_v32  ;;  %v1563_v47 = vsel %vm485_vm0, %v1553_v60, 0.0 }
 0x7f3   : > { %1564 = vadd.xlane.f32.xlu1 %v1563_v47  ;;  %v1523_v17 = vpop.xlane.xlu1 %1522 }
 0x7f4   : > { %v1539_v49 = vmul.f32 0.0625, %v1523_v17  ;;  %v1552_v45 = vmul.f32 %v2453_v44, %v2453_v44 }
 0x7f6   : > { %v2458_v42 = vsub.f32 %v1487_v52, %v1539_v49  ;;  %v1560_v53 = vsel %vm485_vm0, %v1552_v45, 0.0 }
 0x7f7   : > { %1561 = vadd.xlane.f32.xlu0 %v1560_v53  ;;  %v1520_v23 = vpop.xlane.xlu1 %1519 }
 0x7f8   : > { %v1538_v55 = vmul.f32 0.0625, %v1520_v23  ;;  %v1555_v57 = vmul.f32 %v2458_v42, %v2458_v42 }
 0x7fa   : > { %v2463_v59 = vsub.f32 %v1482_v24, %v1538_v55  ;;  %v1569_v51 = vsel %vm485_vm0, %v1555_v57, 0.0 }
 0x7fb   : > { %1570 = vadd.xlane.f32.xlu1 %v1569_v51  ;;  %v1529_v41 = vpop.xlane.xlu1 %1528 }
 0x7fc   : > { %v1541_v62 = vmul.f32 0.0625, %v1529_v41  ;;  %v1554_v63 = vmul.f32 %v2463_v59, %v2463_v59 }
 0x7fe   : > { %v2468_v61 = vsub.f32 %v1497_v31, %v1541_v62  ;;  %v1566_v27 = vsel %vm485_vm0, %v1554_v63, 0.0 }
 0x7ff   : > { %1567 = vadd.xlane.f32.xlu1 %v1566_v27  ;;  %v1526_v26 = vpop.xlane.xlu1 %1525 }
 0x800   : > { %v1540_v46 = vmul.f32 0.0625, %v1526_v26  ;;  %v1557_v1 = vmul.f32 %v2468_v61, %v2468_v61 }
 0x802   : > { %v2473_v3 = vsub.f32 %v1492_v33, %v1540_v46  ;;  %v1575_v4 = vsel %vm485_vm0, %v1557_v1, 0.0 }
 0x803   : > { %1576 = vadd.xlane.f32.xlu1 %v1575_v4  ;;  %v1532_v16 = vpop.xlane.xlu1 %1531 }
 0x804   : > { %v1542_v5 = vmul.f32 0.0625, %v1532_v16  ;;  %v1556_v0 = vmul.f32 %v2473_v3, %v2473_v3 }
 0x806   : > { %v2478_v48 = vsub.f32 %v1502_v2, %v1542_v5  ;;  %v1572_v14 = vsel %vm485_vm0, %v1556_v0, 0.0 }
 0x807   : > { %1573 = vadd.xlane.f32.xlu1 %v1572_v14  ;;  %v1535_v15 = vpop.xlane.xlu1 %1534 }
 0x808   : > { %v1543_v18 = vmul.f32 0.0625, %v1535_v15  ;;  %v1558_v50 = vmul.f32 %v2478_v48, %v2478_v48 }
 0x80a   : > { %v2483_v6 = vsub.f32 %v1507_v35, %v1543_v18  ;;  %v1578_v7 = vsel %vm485_vm0, %v1558_v50, 0.0 }
 0x80b   : > { %1579 = vadd.xlane.f32.xlu1 %v1578_v7 }
 0x80c   : > { %v1559_v8 = vmul.f32 %v2483_v6, %v2483_v6 }
 0x80e   : > { %v1581_v9 = vsel %vm485_vm0, %v1559_v8, 0.0 }
 0x80f   : > { %1582 = vadd.xlane.f32.xlu1 %v1581_v9 }
 0x880   : > { %v1565_v10 = vpop.xlane.xlu1 %1564 }
 0x881   : > { %v1585_v22 = vmul.f32 0.0625, %v1565_v10 }
 0x883   : > { %v1593_v19 = vadd.f32 1e-05, %v1585_v22 }
 0x884   : > { %v1562_v28 = vpop.xlane.xlu0 %1561 }
 0x885   : > { %2004 = vrsqrt.f32 %v1593_v19  ;;  %v1584_v11 = vmul.f32 0.0625, %v1562_v28 }
 0x887   : > { %v1592_v12 = vadd.f32 1e-05, %v1584_v11 }
 0x888   : > { %v1571_v25 = vpop.xlane.xlu1 %1570 }
 0x889   : > { %2006 = vrsqrt.f32 %v1592_v12  ;;  %v1587_v52 = vmul.f32 0.0625, %v1571_v25 }
 0x88b   : > { %v1595_v21 = vadd.f32 1e-05, %v1587_v52 }
 0x88c   : > { %v1568_v29 = vpop.xlane.xlu1 %1567 }
 0x88d   : > { %2008 = vrsqrt.f32 %v1595_v21  ;;  %v1586_v13 = vmul.f32 0.0625, %v1568_v29 }
 0x88f   : > { %v2005_v24 = vpop.eup %2004  ;;  %v1594_v20 = vadd.f32 1e-05, %v1586_v13 }
 0x890   : > { %v1609_v54 = vmul.f32 %v2005_v24, %v2449_v40  ;;  %v1577_v31 = vpop.xlane.xlu1 %1576 }
 0x891   : > { %2010 = vrsqrt.f32 %v1594_v20  ;;  %v1589_v33 = vmul.f32 0.0625, %v1577_v31 }
 0x892   : > { %v1623_v56 = vmul.f32 %v1754_v36, %v1609_v54 }
 0x893   : > { %v2007_v2 = vpop.eup %2006  ;;  %v1597_v34 = vadd.f32 1e-05, %v1589_v33 }
 0x894   : > { %v1637_v35 = vadd.f32 %v1755_v30, %v1623_v56  ;;  %v1608_v38 = vmul.f32 %v2007_v2, %v2453_v44  ;;  %v1574_v58 = vpop.xlane.xlu1 %1573 }
 0x895   : > { %2012 = vrsqrt.f32 %v1597_v34  ;;  %v1588_v39 = vmul.f32 0.0625, %v1574_v58 }
 0x896   : > { %1645 = vst.msk [vmem:[%s2501_s27 + $0x8] sm:$0xff] %vm485_vm0, %v1637_v35  ;;  %v1622_v37 = vmul.f32 %v1754_v36, %v1608_v38 }
 0x897   : > { %v2009_v40 = vpop.eup %2008  ;;  %v1596_v43 = vadd.f32 1e-05, %v1588_v39 }
 0x898   : > { %v1636_v32 = vadd.f32 %v1755_v30, %v1622_v37  ;;  %v1611_v60 = vmul.f32 %v2009_v40, %v2458_v42  ;;  %v1580_v47 = vpop.xlane.xlu1 %1579 }
 0x899   : > { %2014 = vrsqrt.f32 %v1596_v43  ;;  %v1590_v17 = vmul.f32 0.0625, %v1580_v47 }
 0x89a   : > { %1644 = vst.msk [vmem:[%s2501_s27] sm:$0xff] %vm485_vm0, %v1636_v32  ;;  %v1625_v49 = vmul.f32 %v1754_v36, %v1611_v60 }
 0x89b   : > { %v2011_v44 = vpop.eup %2010  ;;  %v1598_v45 = vadd.f32 1e-05, %v1590_v17 }
 0x89c   : > { %v1639_v53 = vadd.f32 %v1755_v30, %v1625_v49  ;;  %v1610_v23 = vmul.f32 %v2011_v44, %v2463_v59  ;;  %v1583_v55 = vpop.xlane.xlu1 %1582 }
 0x89d   : > { %2016 = vrsqrt.f32 %v1598_v45  ;;  %v1591_v57 = vmul.f32 0.0625, %v1583_v55 }
 0x89e   : > { %1647 = vst.msk [vmem:[%s2501_s27 + $0x18] sm:$0xff] %vm485_vm0, %v1639_v53  ;;  %v1624_v51 = vmul.f32 %v1754_v36, %v1610_v23 }
 0x89f   : > { %v2013_v42 = vpop.eup %2012  ;;  %v1599_v41 = vadd.f32 1e-05, %v1591_v57 }
 0x8a0   : > { %v1638_v62 = vadd.f32 %v1755_v30, %v1624_v51  ;;  %v1613_v63 = vmul.f32 %v2013_v42, %v2468_v61 }
 0x8a1   : > { %2018 = vrsqrt.f32 %v1599_v41 }
 0x8a2   : > { %1646 = vst.msk [vmem:[%s2501_s27 + $0x10] sm:$0xff] %vm485_vm0, %v1638_v62  ;;  %v1627_v27 = vmul.f32 %v1754_v36, %v1613_v63 }
 0x8a3   : > { %v2015_v26 = vpop.eup %2014 }
 0x8a4   : > { %v1641_v59 = vadd.f32 %v1755_v30, %v1627_v27  ;;  %v1612_v46 = vmul.f32 %v2015_v26, %v2473_v3 }
 0x8a6   : > { %1649 = vst.msk [vmem:[%s2501_s27 + $0x28] sm:$0xff] %vm485_vm0, %v1641_v59  ;;  %v1626_v1 = vmul.f32 %v1754_v36, %v1612_v46 }
 0x8a7   : > { %v2017_v4 = vpop.eup %2016 }
 0x8a8   : > { %v1640_v16 = vadd.f32 %v1755_v30, %v1626_v1  ;;  %v1614_v5 = vmul.f32 %v2017_v4, %v2478_v48 }
 0x8aa   : > { %1648 = vst.msk [vmem:[%s2501_s27 + $0x20] sm:$0xff] %vm485_vm0, %v1640_v16  ;;  %v1628_v61 = vmul.f32 %v1754_v36, %v1614_v5 }
 0x8ab   : > { %v2019_v0 = vpop.eup %2018 }
 0x8ac   : > { %v1642_v14 = vadd.f32 %v1755_v30, %v1628_v61  ;;  %v1615_v15 = vmul.f32 %v2019_v0, %v2483_v6 }
 0x8ae   : > { %1650 = vst.msk [vmem:[%s2501_s27 + $0x30] sm:$0xff] %vm485_vm0, %v1642_v14  ;;  %v1629_v18 = vmul.f32 %v1754_v36, %v1615_v15 }
 0x8b0   : > { %v1643_v50 = vadd.f32 %v1755_v30, %v1629_v18 }
 0x8b2   : > { %1651 = vst.msk [vmem:[%s2501_s27 + $0x38] sm:$0xff] %vm485_vm0, %v1643_v50 }
 0x8b3 PF: > { %s24_s29 = sadd.s32 1, %s2026_s29  }
 0x8b4   : > { %p21_p4 = scmp.ge.s32.totalorder %s24_s29, 6  }
 0x8b6   :  { %23 = sbr.rel (!%p21_p4) target bundleno = 1 (0x1), region = 106 }

</bundles_post_ra>
